<compile_context>
chip_gen: v7x
topology: tpu7x:2x2x1
jax: 0.10.0
libtpu: 0.0.40
codegen_flags: <defaults>
</compile_context>

<pallas_src>
import functools

import jax
import jax.numpy as jnp
from jax.experimental import pallas as pl
from jax.experimental.pallas import tpu as pltpu

BN_EPS = 1e-5


def _round_up(x, m):
    return (x + m - 1) // m * m


def _gram_kernel(p_ref, g_ref, s_ref):
    """Accumulate G += p^T @ p and s += column-sum(p) for one token tile."""
    @pl.when(pl.program_id(1) == 0)
    def _():
        g_ref[...] = jnp.zeros_like(g_ref)
        s_ref[...] = jnp.zeros_like(s_ref)

    p = p_ref[...]
    g = jax.lax.dot_general(p, p, (((0,), (0,)), ((), ())),
                            preferred_element_type=jnp.float32)
    g_ref[0] += g
    s_ref[0] += jnp.sum(p.astype(jnp.float32), axis=0, keepdims=True)


def _proj_kernel(p_ref, w_ref, b_ref, o_ref):
    """out = patches @ W_folded + b_folded  (BatchNorm already folded in)."""
    acc = jnp.dot(p_ref[...], w_ref[...], preferred_element_type=jnp.float32)
    o_ref[...] = (acc + b_ref[...]).astype(o_ref.dtype)


def patch_embed_forward(x_nchw, params, *, patch_size, tm=512, use_bf16=True,
                        stats_cores=2):
    """PatchEmbed forward. x_nchw: (B, C_in, H, W) f32. Returns NCHW f32."""
    B, C_in, H, W = x_nchw.shape
    P = patch_size
    assert H % P == 0 and W % P == 0
    Hp, Wp = H // P, W // P
    C_out = params["w"].shape[0]
    K = C_in * P * P
    N = B * Hp * Wp

    # --- XLA glue: non-overlapping patch extraction, NCHW -> (N, K). ---
    # TODO(synk): fuse patchify into the kernels via a (B, Hp) grid whose
    # index_map reads (1, C_in, P, W) NCHW blocks directly.
    patches = x_nchw.reshape(B, C_in, Hp, P, Wp, P)
    patches = jnp.transpose(patches, (0, 2, 4, 1, 3, 5)).reshape(N, K)

    # Conv2d weight (C_out, C_in, P, P) -> (K, C_out); flatten order (ci, ph, pw)
    # matches the patch flattening above.
    w = params["w"].reshape(C_out, K).T.astype(jnp.float32)
    b = params["b"].reshape(1, C_out).astype(jnp.float32)

    # --- Tiling: token tile tm (multiple of 8), lane-dense C, unpadded K. ---
    tm = _round_up(max(8, min(tm, N)), 8)
    C_pad = _round_up(C_out, 128)
    n_tiles = -(-N // tm)
    n_split = stats_cores if n_tiles >= stats_cores else 1   # v7x: 2 TCs/chip
    n_steps = -(-n_tiles // n_split)
    n_total = n_split * n_steps
    N_pad = n_total * tm

    mm_dtype = jnp.bfloat16 if use_bf16 else jnp.float32
    itemsize = jnp.dtype(mm_dtype).itemsize
    patches_mm = patches.astype(mm_dtype)
    if N_pad != N:
        # At most n_split*tm - 1 zero rows; zero rows contribute nothing to the
        # Gram stats, and pass-2 garbage rows are sliced off below.
        patches_mm = jnp.pad(patches_mm, ((0, N_pad - N), (0, 0)))

    w_p = jnp.pad(w, ((0, 0), (0, C_pad - C_out)))
    b_p = jnp.pad(b, ((0, 0), (0, C_pad - C_out)))
    gamma_p = jnp.pad(params["gamma"].astype(jnp.float32), (0, C_pad - C_out))
    beta_p = jnp.pad(params["beta"].astype(jnp.float32), (0, C_pad - C_out))

    # --- Pass 1: Gram stats G = P^T P, s = column-sum(P), split across TCs. ---
    g_all, s_all = pl.pallas_call(
        _gram_kernel,
        out_shape=(jax.ShapeDtypeStruct((n_split, K, K), jnp.float32),
                   jax.ShapeDtypeStruct((n_split, 1, K), jnp.float32)),
        grid=(n_split, n_steps),
        in_specs=[pl.BlockSpec((tm, K), lambda c, i: (c * n_steps + i, 0))],
        out_specs=(pl.BlockSpec((1, K, K), lambda c, i: (c, 0, 0)),
                   pl.BlockSpec((1, 1, K), lambda c, i: (c, 0, 0))),
        compiler_params=pltpu.CompilerParams(
            dimension_semantics=("parallel", "arbitrary")),
        cost_estimate=pl.CostEstimate(
            flops=2 * N_pad * K * K, transcendentals=0,
            bytes_accessed=N_pad * K * itemsize + n_split * (K + 1) * K * 4),
    )(patches_mm)

    G = jnp.sum(g_all, axis=0)                  # (K, K)
    s = jnp.sum(s_all, axis=0).reshape(K)       # (K,)

    # --- Derive BN batch stats of h = P @ W + b analytically (tiny XLA). ---
    # NOTE: E[h^2] - E[h]^2 in f32; fine here (|mean| << std).  For strongly
    # off-centered real activations, accumulate around a per-channel shift.
    b_vec = b_p.reshape(C_pad)
    sW = s @ w_p                                # (C_pad,)
    mean = (sW + N * b_vec) / N
    quad = jnp.sum(w_p * (G @ w_p), axis=0)     # diag(W^T G W)
    ex2 = (quad + 2.0 * b_vec * sW + N * b_vec * b_vec) / N
    var = jnp.maximum(ex2 - mean * mean, 0.0)   # biased var (BN training fwd)
    scale = gamma_p * jax.lax.rsqrt(var + BN_EPS)
    shift = beta_p - mean * scale

    # Fold BN into the projection: y = P @ (W*scale) + (b*scale + shift).
    w_fold = (w_p * scale[None, :]).astype(mm_dtype)
    b_fold = (b_p * scale[None, :] + shift[None, :]).astype(jnp.float32)

    # --- Pass 2: tiled matmul + bias, lane-dense output, parallel token axis. ---
    out = pl.pallas_call(
        _proj_kernel,
        out_shape=jax.ShapeDtypeStruct((N_pad, C_pad), jnp.float32),
        grid=(n_total,),
        in_specs=[pl.BlockSpec((tm, K), lambda i: (i, 0)),
                  pl.BlockSpec((K, C_pad), lambda i: (0, 0)),   # VMEM-resident
                  pl.BlockSpec((1, C_pad), lambda i: (0, 0))],
        out_specs=pl.BlockSpec((tm, C_pad), lambda i: (i, 0)),
        compiler_params=pltpu.CompilerParams(
            dimension_semantics=("parallel",)),  # megacore sharding
        cost_estimate=pl.CostEstimate(
            flops=2 * N_pad * K * C_pad, transcendentals=0,
            bytes_accessed=(N_pad * K * itemsize + K * C_pad * itemsize
                            + N_pad * C_pad * 4)),
    )(patches_mm, w_fold, b_fold)

    # --- XLA glue: drop padding, tokens -> NCHW. ---
    # TODO(synk): return NHWC (skip this transpose) if downstream accepts it.
    y = out[:N, :C_out].reshape(B, Hp, Wp, C_out)
    return jnp.transpose(y, (0, 3, 1, 2))


def reference_forward(x_nchw, params, *, patch_size):
    """Pure-JAX reference: Conv2d(P, stride=P) + training-mode BatchNorm2d."""
    P = patch_size
    y = jax.lax.conv_general_dilated(
        x_nchw, params["w"], window_strides=(P, P), padding="VALID",
        dimension_numbers=("NCHW", "OIHW", "NCHW"),
        precision=jax.lax.Precision.HIGHEST)
    y = y + params["b"].reshape(1, -1, 1, 1)
    mean = jnp.mean(y, axis=(0, 2, 3), keepdims=True)
    var = jnp.mean((y - mean) ** 2, axis=(0, 2, 3), keepdims=True)
    yn = (y - mean) * jax.lax.rsqrt(var + BN_EPS)
    return (yn * params["gamma"].reshape(1, -1, 1, 1)
            + params["beta"].reshape(1, -1, 1, 1))


if __name__ == "__main__":
    # conf.in_channels = 3, conf.patch_size = 4, conf.enc.dims[0] = 96
    B, C_in, H, W = 2, 3, 64, 64
    patch_size = 4
    embed_dim = 96

    key = jax.random.PRNGKey(0)
    kx, kw, kb, kg, kbe = jax.random.split(key, 5)
    x = jax.random.normal(kx, (B, C_in, H, W), jnp.float32)
    params = {
        # Conv2d(C_in, embed_dim, kernel_size=P, stride=P)
        "w": 0.05 * jax.random.normal(
            kw, (embed_dim, C_in, patch_size, patch_size), jnp.float32),
        "b": 0.05 * jax.random.normal(kb, (embed_dim,), jnp.float32),
        # BatchNorm2d affine (randomized to exercise the scale/shift folding).
        "gamma": 1.0 + 0.1 * jax.random.normal(kg, (embed_dim,), jnp.float32),
        "beta": 0.1 * jax.random.normal(kbe, (embed_dim,), jnp.float32),
    }

    ref = reference_forward(x, params, patch_size=patch_size)

    # f32 path: tight check of the Gram-stats math and the BN folding.
    # tm=128 on this small input exercises both the core-split parallel axis
    # and the multi-step accumulation axis of pass 1.
    fwd_f32 = jax.jit(functools.partial(
        patch_embed_forward, patch_size=patch_size, tm=128, use_bf16=False))
    out_f32 = fwd_f32(x, params)
    jax.block_until_ready(out_f32)
    assert out_f32.shape == (B, embed_dim, H // patch_size, W // patch_size)
    err_f32 = jnp.max(jnp.abs(out_f32 - ref))
    assert jnp.allclose(out_f32, ref, atol=2e-3, rtol=2e-3), (
        f"f32 path mismatch vs reference: max abs err = {err_f32:.3e}")

    # bf16 path: production default (halved patches HBM traffic); looser
    # tolerance accounts for bf16 input rounding under f32 accumulation.
    fwd_bf16 = jax.jit(functools.partial(
        patch_embed_forward, patch_size=patch_size, tm=128, use_bf16=True))
    out_bf16 = fwd_bf16(x, params)
    jax.block_until_ready(out_bf16)
    err_bf16 = jnp.max(jnp.abs(out_bf16 - ref))
    assert jnp.allclose(out_bf16, ref, atol=5e-2, rtol=5e-2), (
        f"bf16 path mismatch vs reference: max abs err = {err_bf16:.3e}")

    print("KERNEL_OK")
</pallas_src>

<mosaic_0001>
module attributes {stable_mosaic.version = 11 : i64} {
  func.func @_gram_kernel(%arg0: i32, %arg1: i32, %arg2: memref<128x48xf32, #tpu.memory_space<vmem>>, %arg3: memref<1x48x48xf32, #tpu.memory_space<vmem>>, %arg4: memref<1x1x48xf32, #tpu.memory_space<vmem>>) attributes {dimension_semantics = [#tpu.dimension_semantics<parallel>, #tpu.dimension_semantics<arbitrary>], iteration_bounds = array<i64: 2, 2>, scalar_prefetch = 0 : i64, scratch_operands = 0 : i64, tpu.core_type = #tpu.core_type<tc>, window_params = [{transform_indices = @transform_0, window_bounds = array<i64: 128, 48>}, {transform_indices = @transform_1, window_bounds = array<i64: 1, 48, 48>}, {transform_indices = @transform_2, window_bounds = array<i64: 1, 1, 48>}]} {
    %c0_i32 = arith.constant 0 : i32
    %0 = arith.cmpi eq, %arg1, %c0_i32 : i32
    %1 = arith.extui %0 : i1 to i32
    %c0_i32_0 = arith.constant 0 : i32
    %2 = arith.cmpi ne, %1, %c0_i32_0 : i32
    scf.if %2 {
      %cst_15 = arith.constant 0.000000e+00 : f32
      %19 = vector.broadcast %cst_15 : f32 to vector<1x48x48xf32>
      %c0_16 = arith.constant 0 : index
      %c0_17 = arith.constant 0 : index
      %c0_18 = arith.constant 0 : index
      %20 = vector.load %arg3[%c0_16, %c0_17, %c0_18] : memref<1x48x48xf32, #tpu.memory_space<vmem>>, vector<1x48x48xf32>
      tpu.vector_store %arg3[%c0_16, %c0_17, %c0_18], %19 {strides = array<i32>} : memref<1x48x48xf32, #tpu.memory_space<vmem>>, vector<1x48x48xf32>,
      %cst_19 = arith.constant 0.000000e+00 : f32
      %21 = vector.broadcast %cst_19 : f32 to vector<1x1x48xf32>
      %c0_20 = arith.constant 0 : index
      %c0_21 = arith.constant 0 : index
      %c0_22 = arith.constant 0 : index
      %22 = vector.load %arg4[%c0_20, %c0_21, %c0_22] : memref<1x1x48xf32, #tpu.memory_space<vmem>>, vector<1x1x48xf32>
      tpu.vector_store %arg4[%c0_20, %c0_21, %c0_22], %21 {strides = array<i32>} : memref<1x1x48xf32, #tpu.memory_space<vmem>>, vector<1x1x48xf32>,
    } else {
    }
    %c0 = arith.constant 0 : index
    %c0_1 = arith.constant 0 : index
    %3 = vector.load %arg2[%c0, %c0_1] : memref<128x48xf32, #tpu.memory_space<vmem>>, vector<128x48xf32>
    %cst = arith.constant dense<0.000000e+00> : vector<48x48xf32>
    %4 = tpu.matmul %3, %3, %cst {dimension_numbers = #tpu.dot_dimension_numbers<[0], [0], [1], [1], [0, 1, 1, 1], [], []>} : vector<128x48xf32>, vector<128x48xf32>, vector<48x48xf32> -> vector<48x48xf32>
    %c0_2 = arith.constant 0 : index
    %c0_3 = arith.constant 0 : index
    %c0_4 = arith.constant 0 : index
    %5 = vector.load %arg3[%c0_2, %c0_3, %c0_4] : memref<1x48x48xf32, #tpu.memory_space<vmem>>, vector<1x48x48xf32>
    %6 = vector.shape_cast %5 : vector<1x48x48xf32> to vector<48x48xf32>
    %7 = arith.addf %6, %4 : vector<48x48xf32>
    %c0_5 = arith.constant 0 : index
    %c0_6 = arith.constant 0 : index
    %c0_7 = arith.constant 0 : index
    %8 = vector.load %arg3[%c0_5, %c0_6, %c0_7] : memref<1x48x48xf32, #tpu.memory_space<vmem>>, vector<1x48x48xf32>
    %9 = vector.shape_cast %8 : vector<1x48x48xf32> to vector<48x48xf32>
    %10 = vector.shape_cast %7 : vector<48x48xf32> to vector<1x48x48xf32>
    tpu.vector_store %arg3[%c0_5, %c0_6, %c0_7], %10 {strides = array<i32>} : memref<1x48x48xf32, #tpu.memory_space<vmem>>, vector<1x48x48xf32>,
    %c0_8 = arith.constant 0 : index
    %c0_9 = arith.constant 0 : index
    %c0_10 = arith.constant 0 : index
    %11 = vector.load %arg4[%c0_8, %c0_9, %c0_10] : memref<1x1x48xf32, #tpu.memory_space<vmem>>, vector<1x1x48xf32>
    %12 = vector.shape_cast %11 : vector<1x1x48xf32> to vector<1x48xf32>
    %cst_11 = arith.constant dense<0.000000e+00> : vector<48xf32>
    %13 = vector.multi_reduction <add>, %3, %cst_11 [0] : vector<128x48xf32> to vector<48xf32>
    %14 = vector.shape_cast %13 : vector<48xf32> to vector<1x48xf32>
    %15 = arith.addf %12, %14 : vector<1x48xf32>
    %c0_12 = arith.constant 0 : index
    %c0_13 = arith.constant 0 : index
    %c0_14 = arith.constant 0 : index
    %16 = vector.load %arg4[%c0_12, %c0_13, %c0_14] : memref<1x1x48xf32, #tpu.memory_space<vmem>>, vector<1x1x48xf32>
    %17 = vector.shape_cast %16 : vector<1x1x48xf32> to vector<1x48xf32>
    %18 = vector.shape_cast %15 : vector<1x48xf32> to vector<1x1x48xf32>
    tpu.vector_store %arg4[%c0_12, %c0_13, %c0_14], %18 {strides = array<i32>} : memref<1x1x48xf32, #tpu.memory_space<vmem>>, vector<1x1x48xf32>,
    return
  }
  func.func @transform_0(%arg0: i32, %arg1: i32) -> (i32, i32) {
    %c2_i32 = arith.constant 2 : i32
    %0 = arith.muli %arg0, %c2_i32 : i32
    %1 = arith.addi %0, %arg1 : i32
    %c0_i32 = arith.constant 0 : i32
    %c0_i32_0 = arith.constant 0 : i32
    return %1, %c0_i32 : i32, i32
  }
  func.func @transform_1(%arg0: i32, %arg1: i32) -> (i32, i32, i32) {
    %c0_i32 = arith.constant 0 : i32
    %c0_i32_0 = arith.constant 0 : i32
    %c0_i32_1 = arith.constant 0 : i32
    return %arg0, %c0_i32, %c0_i32_0 : i32, i32, i32
  }
  func.func @transform_2(%arg0: i32, %arg1: i32) -> (i32, i32, i32) {
    %c0_i32 = arith.constant 0 : i32
    %c0_i32_0 = arith.constant 0 : i32
    %c0_i32_1 = arith.constant 0 : i32
    return %arg0, %c0_i32, %c0_i32_0 : i32, i32, i32
  }
}

module attributes {stable_mosaic.version = 11 : i64} {
  func.func @_proj_kernel(%arg0: i32, %arg1: memref<128x48xf32, #tpu.memory_space<vmem>>, %arg2: memref<48x128xf32, #tpu.memory_space<vmem>>, %arg3: memref<1x128xf32, #tpu.memory_space<vmem>>, %arg4: memref<128x128xf32, #tpu.memory_space<vmem>>) attributes {dimension_semantics = [#tpu.dimension_semantics<parallel>], iteration_bounds = array<i64: 4>, scalar_prefetch = 0 : i64, scratch_operands = 0 : i64, tpu.core_type = #tpu.core_type<tc>, window_params = [{transform_indices = @transform_0, window_bounds = array<i64: 128, 48>}, {pipeline_mode = #tpu.pipeline_mode<synchronous>, transform_indices = @transform_1, window_bounds = array<i64: 48, 128>}, {pipeline_mode = #tpu.pipeline_mode<synchronous>, transform_indices = @transform_2, window_bounds = array<i64: 1, 128>}, {transform_indices = @transform_3, window_bounds = array<i64: 128, 128>}]} {
    %c0 = arith.constant 0 : index
    %c0_0 = arith.constant 0 : index
    %0 = vector.load %arg1[%c0, %c0_0] : memref<128x48xf32, #tpu.memory_space<vmem>>, vector<128x48xf32>
    %c0_1 = arith.constant 0 : index
    %c0_2 = arith.constant 0 : index
    %1 = vector.load %arg2[%c0_1, %c0_2] : memref<48x128xf32, #tpu.memory_space<vmem>>, vector<48x128xf32>
    %cst = arith.constant dense<0.000000e+00> : vector<128x128xf32>
    %2 = tpu.matmul %0, %1, %cst {dimension_numbers = #tpu.dot_dimension_numbers<[1], [0], [0], [1], [0, 0, 1, 1], [], []>} : vector<128x48xf32>, vector<48x128xf32>, vector<128x128xf32> -> vector<128x128xf32>
    %c0_3 = arith.constant 0 : index
    %c0_4 = arith.constant 0 : index
    %3 = vector.load %arg3[%c0_3, %c0_4] : memref<1x128xf32, #tpu.memory_space<vmem>>, vector<1x128xf32>
    %4 = vector.broadcast %3 : vector<1x128xf32> to vector<128x128xf32>
    %5 = arith.addf %2, %4 : vector<128x128xf32>
    %c0_5 = arith.constant 0 : index
    %c0_6 = arith.constant 0 : index
    %6 = vector.load %arg4[%c0_5, %c0_6] : memref<128x128xf32, #tpu.memory_space<vmem>>, vector<128x128xf32>
    tpu.vector_store %arg4[%c0_5, %c0_6], %5 {strides = array<i32>} : memref<128x128xf32, #tpu.memory_space<vmem>>, vector<128x128xf32>,
    return
  }
  func.func @transform_0(%arg0: i32) -> (i32, i32) {
    %c0_i32 = arith.constant 0 : i32
    %c0_i32_0 = arith.constant 0 : i32
    return %arg0, %c0_i32 : i32, i32
  }
  func.func @transform_1(%arg0: i32) -> (i32, i32) {
    %c0_i32 = arith.constant 0 : i32
    %c0_i32_0 = arith.constant 0 : i32
    %c0_i32_1 = arith.constant 0 : i32
    return %c0_i32, %c0_i32_0 : i32, i32
  }
  func.func @transform_2(%arg0: i32) -> (i32, i32) {
    %c0_i32 = arith.constant 0 : i32
    %c0_i32_0 = arith.constant 0 : i32
    %c0_i32_1 = arith.constant 0 : i32
    return %c0_i32, %c0_i32_0 : i32, i32
  }
  func.func @transform_3(%arg0: i32) -> (i32, i32) {
    %c0_i32 = arith.constant 0 : i32
    %c0_i32_0 = arith.constant 0 : i32
    return %arg0, %c0_i32 : i32, i32
  }
}

</mosaic_0001>

<bundles_post_ra>
// kernel: patch_embed_forward.2
= control target key start
LH: loop header
LB: loop body
LE: loop exit
PB: predicated region body
PF: predicated region fallthrough
CT: control target
= control target key end

     0   :  { %s711_s9 = smov 0   ;;  %s713_s10 = smov 0   ;;  %s830_s0 = inlined_call_operand.vmem [shape: f32[512,48], index: 0, kind: input, shape index: {}]   ;;  %s831_s1 = inlined_call_operand.vmem [shape: f32[2,48,48], index: 1, kind: output, shape index: {0}]   ;;  %s832_s2 = inlined_call_operand.vmem [shape: f32[2,1,48], index: 2, kind: output, shape index: {1}]  }
   0x1   :  { %s715_s11 = smov 0   ;;  %s717_s12 = smov 0  }
   0x2   :  { %s719_s13 = smov 0  }
   0x3 LB: > { %s22_s14 = sadd.s32 1, %s685_s11  ;;  %s25_s15 = sadd.s32 1, %s689_s12  ;;  %s693_s13 = sphi %s719_s13, %s13_s13   ;;  %s689_s12 = sphi %s717_s12, %s836_s12   ;;  %s685_s11 = sphi %s715_s11, %s835_s11   ;;  %s681_s10 = sphi %s713_s10, %s834_s10   ;;  %s677_s9 = sphi %s711_s9, %s833_s9  }
   0x4   : > { %p23_p0 = scmp.ge.s32.totalorder %s22_s14, 2  ;;  %p494_p1 = scmp.ge.s32.totalorder %s693_s13, 1 }
   0x5   : > { %p136_p2 = scmp.lt.s32.totalorder %s693_s13, 5 }
   0x6   : > { %s838_s14 = smov (%p23_p0, %s22_s14), 0  ;;  %s840_s15 = smov (!%p23_p0, %s25_s15), %s689_s12 }
   0x7   : > { %p137_p3 = pnand %p494_p1, %p136_p2  ;;  %p27_p4 = scmp.ge.s32.totalorder %s840_s15, 2 }
   0x8   : > { %s495_s16 = sshll.u32 (!%p137_p3), %s681_s10, 1  ;;  %p173_p5 = scmp.lt.s32.totalorder (!%p137_p3), %s681_s10, 1 }
   0x9   : > { %s842_s15 = smov (%p27_p4, %s840_s15), 0  ;;  %140 = sbr.rel (%p137_p3) target bundleno = 391 (0x187), region = 24 }
   0xa   : > { %s164_s17 = sadd.s32 (!%p137_p3), %s677_s9, %s495_s16  ;;  %p499_p7 = scmp.ne.s32.totalorder (!%p137_p3), %s677_s9, 0 }
   0xb   : > { %s496_s18 = sshll.u32 (!%p137_p3), %s164_s17, 4 }
   0xc   : > { %p166_p6 = scmp.lt.s32.totalorder (!%p137_p3), %s496_s18, 63 }
  0x10   : > { %s844_s10 = smov (!%p173_p5, %s681_s10), 1  ;;  %s846_s18 = smov (!%p166_p6, %s496_s18), 63 }
  0x11   : > { %s613_s19 = smul.u32 48, %s844_s10  ;;  %s744_s22 = scalar_lea.vmem %s832_s2, %s844_s10  ;;  %vm185_vm0 = vcmask (!%p499_p7), 392192   ;;  %vm192_vm1 = vcmask (!%p499_p7), 385024   ;;  %v695_v0 = vmov (!%p499_p7), 0.0  }
  0x12   : > { %s497_s23 = sshll.u32 %s846_s18, 3  ;;  %184 = sbr.rel (%p499_p7) target bundleno = 25 (0x19), region = 28  ;;  %193 = vst.msk [vmem:[%s744_s22] sm:$0x1] (!%p499_p7), %vm192_vm1, %v695_v0 }
  0x13   : > { %s749_s26 = scalar_lea.vmem %s830_s0, %s497_s23  ;;  %s754_s29 = scalar_lea.vmem %s831_s1, %s613_s19 }
  0x14   : > { %186 = vst.msk [vmem:[%s754_s29] sm:$0xff] (!%p499_p7), %vm185_vm0, %v695_v0  ;;  %187 = vst.msk [vmem:[%s754_s29 + $0x8] sm:$0xff] (!%p499_p7), %vm185_vm0, %v695_v0 }
  0x15   : > { %188 = vst.msk [vmem:[%s754_s29 + $0x10] sm:$0xff] (!%p499_p7), %vm185_vm0, %v695_v0  ;;  %189 = vst.msk [vmem:[%s754_s29 + $0x18] sm:$0xff] (!%p499_p7), %vm185_vm0, %v695_v0 }
  0x16   : > { %190 = vst.msk [vmem:[%s754_s29 + $0x20] sm:$0xff] (!%p499_p7), %vm185_vm0, %v695_v0  ;;  %191 = vst.msk [vmem:[%s754_s29 + $0x28] sm:$0xff] (!%p499_p7), %vm185_vm0, %v695_v0 }
  0x19 PF: > { %v194_v1 = vld [vmem:[%s749_s26] sm:$0xff]  ;;  %vm349_vm2 = vcmask 392192   ;;  %v195_v2 = vld [vmem:[%s749_s26 + $0x8] sm:$0xff]  ;;  %v196_v3 = vld [vmem:[%s749_s26 + $0x10] sm:$0xff]  ;;  %vm395_vm3 = vcmask 385024  }
  0x1a   : > { %210 = vxpose.xlu0.b32.start [1/16] (narrow) %v194_v1, 48  ;;  %v357_v4 = vsel %vm349_vm2, %v194_v1, 0.0  ;;  %v565_v5 = vpack.c.bf16 %v195_v2, %v194_v1  ;;  %v358_v6 = vsel %vm349_vm2, %v195_v2, 0.0  ;;  %v360_v7 = vsel %vm349_vm2, %v196_v3, 0.0  ;;  %v197_v8 = vld [vmem:[%s749_s26 + $0x18] sm:$0xff]  ;;  %v198_v13 = vld [vmem:[%s749_s26 + $0x20] sm:$0xff] }
  0x1b   : > { %v359_v9 = vadd.f32 %v358_v6, %v357_v4  ;;  %v569_v10 = vpack.c.bf16 %v197_v8, %v196_v3  ;;  %v362_v11 = vsel %vm349_vm2, %v197_v8, 0.0  ;;  %v199_v14 = vld [vmem:[%s749_s26 + $0x28] sm:$0xff]  ;;  %v364_v15 = vsel %vm349_vm2, %v198_v13, 0.0  ;;  %v200_v20 = vld [vmem:[%s749_s26 + $0x30] sm:$0xff]  ;;  %v201_v21 = vld [vmem:[%s749_s26 + $0x38] sm:$0xff] }
  0x1c   : > { %566 = vmatprep.subr.bf16.mxu0 %v565_v5  ;;  %597 = vmatprep.subr.bf16.mxu1 %v565_v5  ;;  %v573_v16 = vpack.c.bf16 %v199_v14, %v198_v13  ;;  %v366_v18 = vsel %vm349_vm2, %v199_v14, 0.0  ;;  %v368_v22 = vsel %vm349_vm2, %v200_v20, 0.0  ;;  %v577_v23 = vpack.c.bf16 %v201_v21, %v200_v20  ;;  %v202_v27 = vld [vmem:[%s749_s26 + $0x40] sm:$0xff]  ;;  %v203_v28 = vld [vmem:[%s749_s26 + $0x48] sm:$0xff]  ;;  %v204_v34 = vld [vmem:[%s749_s26 + $0x50] sm:$0xff] }
  0x1d   : > { %v361_v12 = vadd.f32 %v360_v7, %v359_v9  ;;  %568 = vmatpush3.bf16.msra.mxu0 %v565_v5  ;;  %605 = vmatpush3.bf16.msra.mxu1 %v565_v5  ;;  %v370_v25 = vsel %vm349_vm2, %v201_v21, 0.0  ;;  %v372_v29 = vsel %vm349_vm2, %v202_v27, 0.0  ;;  %v581_v30 = vpack.c.bf16 %v203_v28, %v202_v27  ;;  %v205_v35 = vld [vmem:[%s749_s26 + $0x58] sm:$0xff]  ;;  %v206_v41 = vld [vmem:[%s749_s26 + $0x60] sm:$0xff]  ;;  %v207_v42 = vld [vmem:[%s749_s26 + $0x68] sm:$0xff] }
  0x1e   : > { %211 = vxpose.xlu0.b32.cont [2/16] (narrow) %v195_v2, 48  ;;  %570 = vmatprep.subr.bf16.mxu0 %v569_v10  ;;  %v374_v32 = vsel %vm349_vm2, %v203_v28, 0.0  ;;  %v376_v36 = vsel %vm349_vm2, %v204_v34, 0.0  ;;  %v585_v37 = vpack.c.bf16 %v205_v35, %v204_v34  ;;  %v378_v39 = vsel %vm349_vm2, %v205_v35, 0.0  ;;  %v208_v48 = vld [vmem:[%s749_s26 + $0x70] sm:$0xff]  ;;  %v209_v49 = vld [vmem:[%s749_s26 + $0x78] sm:$0xff] }
  0x1f   : > { %v363_v17 = vadd.f32 %v362_v11, %v361_v12  ;;  %598 = vmatprep.subr.bf16.mxu1 %v569_v10  ;;  %v380_v43 = vsel %vm349_vm2, %v206_v41, 0.0  ;;  %v589_v44 = vpack.c.bf16 %v207_v42, %v206_v41  ;;  %v382_v46 = vsel %vm349_vm2, %v207_v42, 0.0  ;;  %v356_v61 = vld [vmem:[%s744_s22] sm:$0x1]  ;;  %v338_v6 = vld [vmem:[%s754_s29 + $0x8] sm:$0xff]  ;;  %v340_v12 = vld [vmem:[%s754_s29 + $0x18] sm:$0xff] }
  0x20   : > { %v384_v50 = vsel %vm349_vm2, %v208_v48, 0.0  ;;  %v593_v51 = vpack.c.bf16 %v209_v49, %v208_v48  ;;  %v386_v53 = vsel %vm349_vm2, %v209_v49, 0.0  ;;  %v337_v7 = vld [vmem:[%s754_s29] sm:$0xff] }
  0x21   : > { %v365_v19 = vadd.f32 %v364_v15, %v363_v17  ;;  %572 = vmatpush3.bf16.msra.mxu0 %v569_v10  ;;  %606 = vmatpush3.bf16.msra.mxu1 %v569_v10 }
  0x22   : > { %212 = vxpose.xlu0.b32.cont [3/16] (narrow) %v196_v3, 48  ;;  %574 = vmatprep.subr.bf16.mxu0 %v573_v16 }
  0x23   : > { %v367_v24 = vadd.f32 %v366_v18, %v365_v19  ;;  %599 = vmatprep.subr.bf16.mxu1 %v573_v16  ;;  %v342_v18 = vld [vmem:[%s754_s29 + $0x28] sm:$0xff]  ;;  %v341_v19 = vld [vmem:[%s754_s29 + $0x20] sm:$0xff] }
  0x25   : > { %v369_v26 = vadd.f32 %v368_v22, %v367_v24  ;;  %576 = vmatpush3.bf16.msra.mxu0 %v573_v16  ;;  %607 = vmatpush3.bf16.msra.mxu1 %v573_v16 }
  0x26   : > { %213 = vxpose.xlu0.b32.cont [4/16] (narrow) %v197_v8, 48  ;;  %578 = vmatprep.subr.bf16.mxu0 %v577_v23 }
  0x27   : > { %v371_v31 = vadd.f32 %v370_v25, %v369_v26  ;;  %600 = vmatprep.subr.bf16.mxu1 %v577_v23 }
  0x29   : > { %v373_v33 = vadd.f32 %v372_v29, %v371_v31  ;;  %580 = vmatpush3.bf16.msra.mxu0 %v577_v23  ;;  %608 = vmatpush3.bf16.msra.mxu1 %v577_v23 }
  0x2a   : > { %214 = vxpose.xlu0.b32.cont [5/16] (narrow) %v198_v13, 48  ;;  %582 = vmatprep.subr.bf16.mxu0 %v581_v30  ;;  %v339_v13 = vld [vmem:[%s754_s29 + $0x10] sm:$0xff] }
  0x2b   : > { %v375_v38 = vadd.f32 %v374_v32, %v373_v33  ;;  %601 = vmatprep.subr.bf16.mxu1 %v581_v30 }
  0x2d   : > { %v377_v40 = vadd.f32 %v376_v36, %v375_v38  ;;  %584 = vmatpush3.bf16.msra.mxu0 %v581_v30  ;;  %609 = vmatpush3.bf16.msra.mxu1 %v581_v30 }
  0x2e   : > { %215 = vxpose.xlu0.b32.cont [6/16] (narrow) %v199_v14, 48  ;;  %586 = vmatprep.subr.bf16.mxu0 %v585_v37 }
  0x2f   : > { %v379_v45 = vadd.f32 %v378_v39, %v377_v40  ;;  %602 = vmatprep.subr.bf16.mxu1 %v585_v37 }
  0x31   : > { %v381_v47 = vadd.f32 %v380_v43, %v379_v45  ;;  %588 = vmatpush3.bf16.msra.mxu0 %v585_v37  ;;  %610 = vmatpush3.bf16.msra.mxu1 %v585_v37 }
  0x32   : > { %216 = vxpose.xlu0.b32.cont [7/16] (narrow) %v200_v20, 48  ;;  %590 = vmatprep.subr.bf16.mxu0 %v589_v44 }
  0x33   : > { %v383_v52 = vadd.f32 %v382_v46, %v381_v47  ;;  %603 = vmatprep.subr.bf16.mxu1 %v589_v44 }
  0x35   : > { %v385_v54 = vadd.f32 %v384_v50, %v383_v52  ;;  %592 = vmatpush3.bf16.msra.mxu0 %v589_v44  ;;  %611 = vmatpush3.bf16.msra.mxu1 %v589_v44 }
  0x36   : > { %217 = vxpose.xlu0.b32.cont [8/16] (narrow) %v201_v21, 48  ;;  %594 = vmatprep.subr.bf16.mxu0 %v593_v51 }
  0x37   : > { %v387_v55 = vadd.f32 %v386_v53, %v385_v54  ;;  %604 = vmatprep.subr.bf16.mxu1 %v593_v51 }
  0x39   : > { %v388_v56 = vrot.slane %v387_v55, 4  ;;  %596 = vmatpush3.bf16.msra.mxu0 %v593_v51  ;;  %612 = vmatpush3.bf16.msra.mxu1 %v593_v51 }
  0x3a   : > { %218 = vxpose.xlu0.b32.cont [9/16] (narrow) %v202_v27, 48 }
  0x3b   : > { %v389_v57 = vadd.f32 %v388_v56, %v387_v55 }
  0x3d   : > { %v390_v58 = vrot.slane %v389_v57, 2 }
  0x3e   : > { %219 = vxpose.xlu0.b32.cont [10/16] (narrow) %v203_v28, 48 }
  0x3f   : > { %v391_v59 = vadd.f32 %v390_v58, %v389_v57 }
  0x41   : > { %v392_v60 = vrot.slane %v391_v59, 1 }
  0x42   : > { %220 = vxpose.xlu0.b32.cont [11/16] (narrow) %v204_v34, 48 }
  0x43   : > { %v393_v62 = vadd.f32 %v392_v60, %v391_v59 }
  0x45   : > { %v394_v63 = vadd.f32 %v393_v62, %v356_v61 }
  0x46   : > { %221 = vxpose.xlu0.b32.cont [12/16] (narrow) %v205_v35, 48 }
  0x47   : > { %396 = vst.msk [vmem:[%s744_s22] sm:$0x1] %vm395_vm3, %v394_v63 }
  0x4a   : > { %222 = vxpose.xlu0.b32.cont [13/16] (narrow) %v206_v41, 48 }
  0x4e   : > { %223 = vxpose.xlu0.b32.cont [14/16] (narrow) %v207_v42, 48 }
  0x52   : > { %224 = vxpose.xlu0.b32.cont [15/16] (narrow) %v208_v48, 48 }
  0x56   : > { %225 = vxpose.xlu0.b32.end [16/16] (narrow) %v209_v49, 48 }
  0x9a   : > { %v226_v0 = vpop.trf.xlu0 }
  0x9b   : > { %556 = vmatprep.mubr.f32.mxu0 %v226_v0 }
  0x9e   : > { %v227_v1 = vpop.trf.xlu0 }
  0x9f   : > { %557 = vmatmul.mubr.f32.vlgmr.msra.gmra.mrb[0].mxu0 %v227_v1 }
  0xa2   : > { %v228_v2 = vpop.trf.xlu0 }
  0xa3   : > { %559 = vmatprep.mubr.f32.mxu1 %v228_v2 }
  0xa6   : > { %v229_v3 = vpop.trf.xlu0 }
  0xa7   : > { %560 = vmatmul.mubr.f32.vlgmr.msra.gmra.mrb[0].mxu1 %v229_v3 }
  0xaa   : > { %v230_v4 = vpop.trf.xlu0 }
  0xab   : > { %562 = vmatprep.mubr.f32.mxu1 %v230_v4 }
  0xae   : > { %v231_v5 = vpop.trf.xlu0 }
  0xaf   : > { %563 = vmatmul.mubr.f32.gmra.mrb[2].mxu1 %v231_v5 }
 0x172   : > { %v558_v8 = vpop.f32.mrb[0].mxu0 }
 0x173   : > { %v344_v9 = vadd.f32 %v558_v8, %v338_v6  ;;  %v308_v10 = vpop.f32.mrb[1].mxu0 }
 0x174   : > { %v343_v11 = vadd.f32 %v337_v7, %v308_v10 }
 0x175   : > { %351 = vst.msk [vmem:[%s754_s29 + $0x8] sm:$0xff] %vm349_vm2, %v344_v9 }
 0x176   : > { %350 = vst.msk [vmem:[%s754_s29] sm:$0xff] %vm349_vm2, %v343_v11 }
 0x17a   : > { %v561_v14 = vpop.f32.mrb[0].mxu1 }
 0x17b   : > { %v346_v15 = vadd.f32 %v561_v14, %v340_v12  ;;  %v318_v16 = vpop.f32.mrb[1].mxu1 }
 0x17c   : > { %v345_v17 = vadd.f32 %v339_v13, %v318_v16 }
 0x17d   : > { %353 = vst.msk [vmem:[%s754_s29 + $0x18] sm:$0xff] %vm349_vm2, %v346_v15 }
 0x17e   : > { %352 = vst.msk [vmem:[%s754_s29 + $0x10] sm:$0xff] %vm349_vm2, %v345_v17 }
 0x182   : > { %v564_v20 = vpop.f32.mrb[2].mxu1 }
 0x183   : > { %v348_v21 = vadd.f32 %v564_v20, %v342_v18  ;;  %v328_v22 = vpop.f32.mrb[3].mxu1 }
 0x184   : > { %v347_v23 = vadd.f32 %v341_v19, %v328_v22 }
 0x185   : > { %355 = vst.msk [vmem:[%s754_s29 + $0x28] sm:$0xff] %vm349_vm2, %v348_v21 }
 0x186   : > { %354 = vst.msk [vmem:[%s754_s29 + $0x20] sm:$0xff] %vm349_vm2, %v347_v23 }
 0x187 PF: > { %s13_s13 = sadd.s32 1, %s693_s13   ;;  %s833_s9 = smov %s685_s11 }
 0x188   : > { %p10_p8 = scmp.ge.s32.totalorder %s13_s13, 6   ;;  %s834_s10 = smov %s689_s12 }
 0x189   : > { %s835_s11 = smov %s838_s14  ;;  %s836_s12 = smov %s842_s15 }
 0x18a   :  { %12 = sbr.rel (!%p10_p8) target bundleno = 3 (0x3), region = 70 }

// kernel: patch_embed_forward.3
= control target key start
LH: loop header
LB: loop body
LE: loop exit
PB: predicated region body
PF: predicated region fallthrough
CT: control target
= control target key end

     0   :  { %8 = vsyncpa [#allocation3], 0  ;;  %s901_s0 = inlined_call_operand.vmem [shape: f32[512,48], index: 0, kind: input, shape index: {}]   ;;  %s902_s1 = inlined_call_operand.vmem [shape: f32[48,128], index: 1, kind: input, shape index: {}]   ;;  %s903_s2 = inlined_call_operand.vmem [shape: f32[1,128], index: 2, kind: input, shape index: {}]   ;;  %s904_s3 = inlined_call_operand.hbm [shape: f32[512,128], index: 3, kind: output, shape index: {}]  }
   0x1   :  { %10 = vsyncpa [#allocation3 + $0x1], 0  ;;  %s721_s12 = smov 0   ;;  %s723_s13 = smov 0  }
   0x2   :  { %s725_s14 = smov 0   ;;  %s727_s15 = smov 0  }
   0x3 LB: > { %s742_s16 = sadd.s32 4294967295, %s696_s15   ;;  %s487_s17 = sadd.s32 4294967294, %s696_s15   ;;  %s696_s15 = sphi %s727_s15, %s910_s15   ;;  %s692_s14 = sphi %s725_s14, %s909_s14   ;;  %s688_s13 = sphi %s723_s13, %s908_s13   ;;  %s684_s12 = sphi %s721_s12, %s907_s12  }
   0x4   : > { %s746_s18 = sadd.s32 1, %s696_s15   ;;  %s91_s19 = sadd.s32 1, %s692_s14 }
   0x5   : > { %s88_s20 = ssub.s32 %s696_s15, %s746_s18  ;;  %p101_p0 = scmp.ne.s32.totalorder %s692_s14, %s688_s13 }
   0x6   : > { %p89_p1 = scmp.eq.s32.totalorder %s88_s20, 0  ;;  %p102_p2 = scmp.eq.s32.totalorder %s742_s16, 3 }
   0x7   : > { %p107_p3 = scmp.ne.s32.totalorder %s688_s13, %s684_s12  ;;  %p108_p4 = scmp.eq.s32.totalorder %s487_s17, 3 }
   0x8   : > { %s757_s21 = scalar_select %p89_p1, %s692_s14, %s91_s19  }
   0x9   : > { %p759_p5 = por %p102_p2, %p101_p0  ;;  %p763_p6 = por %p108_p4, %p107_p3 }
   0xa   : > { %p490_p7 = scmp.ge.s32.totalorder %s696_s15, 1  ;;  %p141_p8 = scmp.lt.s32.totalorder %s696_s15, 5 }
   0xc   : > { %p142_p9 = pnand %p490_p7, %p141_p8 }
   0xd   : > { %v188_v0 = vld [vmem:[%s902_s1] sm:$0xff] (!%p142_p9)  ;;  %v189_v1 = vld [vmem:[%s902_s1 + $0x8] sm:$0xff] (!%p142_p9)  ;;  %v190_v2 = vld [vmem:[%s902_s1 + $0x10] sm:$0xff] (!%p142_p9)  ;;  %s492_s30 = sshll.u32 (!%p142_p9), %s742_s16, 4  ;;  %vm201_vm0 = vcmask (!%p142_p9), 392192   ;;  %s162_s20 = sand.u32 (!%p142_p9), 1, %s688_s13  }
   0xe   : > { %145 = sbr.rel (%p142_p9) target bundleno = 271 (0x10f), region = 32  ;;  %v575_v3 = vpack.c.bf16 (!%p142_p9), %v189_v1, %v188_v0  ;;  %v191_v4 = vld [vmem:[%s902_s1 + $0x18] sm:$0xff] (!%p142_p9)  ;;  %p166_p10 = scmp.lt.s32.totalorder (!%p142_p9), %s492_s30, 63  ;;  %v192_v6 = vld [vmem:[%s902_s1 + $0x20] sm:$0xff] (!%p142_p9)  ;;  %v193_v7 = vld [vmem:[%s902_s1 + $0x28] sm:$0xff] (!%p142_p9) }
   0xf   : > { %v579_v5 = vpack.c.bf16 (!%p142_p9), %v191_v4, %v190_v2  ;;  %v583_v8 = vpack.c.bf16 (!%p142_p9), %v193_v7, %v192_v6  ;;  %s491_s24 = sshll.u32 (!%p142_p9), %s162_s20, 7  ;;  %v494_v25 = vld [vmem:[%s903_s2] ss:$0 sm:$0xff] (!%p142_p9)  ;;  %s516_s28 = sshll.u32 (!%p142_p9), %s742_s16, 11 }
  0x10   : > { %576 = vmatprep.subr.bf16.mxu0 (!%p142_p9), %v575_v3  ;;  %587 = vmatprep.subr.bf16.mxu1 (!%p142_p9), %v575_v3  ;;  %s831_s27 = scalar_lea.vmem (!%p142_p9), [#allocation2], %s491_s24  ;;  %s850_s16 = scalar_lea.hbm (!%p142_p9), %s904_s3, %s516_s28 }
  0x11   : > { %578 = vmatpush3.bf16.msra.mxu0 (!%p142_p9), %v575_v3  ;;  %590 = vmatpush3.bf16.msra.mxu1 (!%p142_p9), %v575_v3  ;;  %s425_s29 = sshll.u32 (!%p142_p9), %s831_s27, 4  ;;  %s860_s5 = scalar_lea.sflag (!%p142_p9), [#allocation3], %s162_s20  ;;  %s852_s29 = int_to_ptr.vmem [resolvable:$true] %s425_s29 }
  0x12   : > { %580 = vmatprep.subr.bf16.mxu0 (!%p142_p9), %v579_v5  ;;  %588 = vmatprep.subr.bf16.mxu1 (!%p142_p9), %v579_v5  ;;  %s634_s6 = scalar_lea.vmem (!%p142_p9), %s852_s29, 2048  ;;  %s698_s7 = smov (!%p142_p9), [#allocation2]  }
  0x13   : > { %p635_p11 = scmp.ne.s32.totalorder (!%p142_p9), %s852_s29, %s634_s6  ;;  %s638_s8 = sshll.u32 (!%p142_p9), %s698_s7, 4  ;;  %s639_s8 = int_to_ptr.vmem [resolvable:$false] %s638_s8 }
  0x14   : > { %s640_s9 = scalar_lea.vmem (!%p142_p9), %s639_s8, 4096  ;;  %p641_p0 = scmp.lt.s32.totalorder (!%p142_p9), %s852_s29, %s639_s8 }
  0x15   : > { %s912_s30 = smov (!%p166_p10, %s492_s30), 63  ;;  %582 = vmatpush3.bf16.msra.mxu0 %v579_v5  ;;  %591 = vmatpush3.bf16.msra.mxu1 %v579_v5  ;;  %p636_p12 = pnand %p635_p11, %p759_p5 }
  0x16   : > { %s493_s10 = sshll.u32 %s912_s30, 3  ;;  %584 = vmatprep.subr.bf16.mxu0 %v583_v8  ;;  %589 = vmatprep.subr.bf16.mxu1 %v583_v8  ;;  %p642_p1 = scmp.lt.s32.totalorder %s640_s9, %s634_s6 }
  0x17   : > { %s791_s19 = scalar_lea.vmem %s901_s0, %s493_s10  ;;  %p637_p13 = pneg %p636_p12 }
  0x18   : > { %v172_v9 = vld [vmem:[%s791_s19] sm:$0xff]  ;;  %v173_v11 = vld [vmem:[%s791_s19 + $0x8] sm:$0xff]  ;;  %v174_v13 = vld [vmem:[%s791_s19 + $0x10] sm:$0xff]  ;;  %p643_p2 = por %p642_p1, %p641_p0 }
  0x19   : > { %v180_v10 = vld [vmem:[%s791_s19 + $0x40] sm:$0xff]  ;;  %551 = vmatprep.mubr.msk.f32.mxu0 %vm201_vm0, %v172_v9  ;;  %586 = vmatpush3.bf16.msra.mxu0 %v583_v8  ;;  %v181_v12 = vld [vmem:[%s791_s19 + $0x48] sm:$0xff]  ;;  %v182_v14 = vld [vmem:[%s791_s19 + $0x50] sm:$0xff] }
  0x1a   : > { %563 = vmatprep.mubr.msk.f32.mxu1 %vm201_vm0, %v180_v10  ;;  %592 = vmatpush3.bf16.msra.mxu1 %v583_v8  ;;  %v175_v15 = vld [vmem:[%s791_s19 + $0x18] sm:$0xff]  ;;  %v176_v17 = vld [vmem:[%s791_s19 + $0x20] sm:$0xff]  ;;  %v177_v19 = vld [vmem:[%s791_s19 + $0x28] sm:$0xff]  ;;  %p644_p3 = pnand %p643_p2, %p637_p13 }
  0x1b   : > { %v183_v16 = vld [vmem:[%s791_s19 + $0x58] sm:$0xff]  ;;  %v184_v18 = vld [vmem:[%s791_s19 + $0x60] sm:$0xff]  ;;  %v185_v20 = vld [vmem:[%s791_s19 + $0x68] sm:$0xff] }
  0x1c   : > { %552 = vmatmul.mubr.msk.f32.vlgmr.msra.gmra.mrb[0].mxu0 %vm201_vm0, %v173_v11  ;;  %v178_v21 = vld [vmem:[%s791_s19 + $0x30] sm:$0xff]  ;;  %v179_v23 = vld [vmem:[%s791_s19 + $0x38] sm:$0xff] }
  0x1d   : > { %564 = vmatmul.mubr.msk.f32.vlgmr.msra.gmra.mrb[0].mxu1 %vm201_vm0, %v181_v12  ;;  %554 = vmatprep.mubr.msk.f32.mxu0 %vm201_vm0, %v174_v13  ;;  %v186_v22 = vld [vmem:[%s791_s19 + $0x70] sm:$0xff]  ;;  %v187_v24 = vld [vmem:[%s791_s19 + $0x78] sm:$0xff] }
  0x1e   : > { %566 = vmatprep.mubr.msk.f32.mxu1 %vm201_vm0, %v182_v14 }
  0x20   : > { %555 = vmatmul.mubr.msk.f32.gmra.mrb[2].mxu0 %vm201_vm0, %v175_v15 }
  0x21   : > { %567 = vmatmul.mubr.msk.f32.gmra.mrb[2].mxu1 %vm201_vm0, %v183_v16  ;;  %557 = vmatprep.mubr.msk.f32.mxu0 %vm201_vm0, %v176_v17 }
  0x22   : > { %569 = vmatprep.mubr.msk.f32.mxu1 %vm201_vm0, %v184_v18 }
  0x24   : > { %558 = vmatmul.mubr.msk.f32.gmra.mrb[4].mxu0 %vm201_vm0, %v177_v19 }
  0x25   : > { %570 = vmatmul.mubr.msk.f32.gmra.mrb[4].mxu1 %vm201_vm0, %v185_v20  ;;  %560 = vmatprep.mubr.msk.f32.mxu0 %vm201_vm0, %v178_v21 }
  0x26   : > { %572 = vmatprep.mubr.msk.f32.mxu1 %vm201_vm0, %v186_v22 }
  0x28   : > { %561 = vmatmul.mubr.msk.f32.gmra.mrb[6].mxu0 %vm201_vm0, %v179_v23 }
  0x29   : > { %573 = vmatmul.mubr.msk.f32.gmra.mrb[6].mxu1 %vm201_vm0, %v187_v24 }
  0xef   : > { %v553_v26 = vpop.f32.mrb[0].mxu0 }
  0xf0   : > { %v565_v27 = vpop.f32.mrb[0].mxu1  ;;  %v322_v28 = vadd.f32 %v553_v26, %v494_v25  ;;  %v316_v30 = vpop.f32.mrb[1].mxu0 }
  0xf1   : > { %v362_v29 = vadd.f32 %v565_v27, %v494_v25  ;;  %v356_v31 = vpop.f32.mrb[1].mxu1  ;;  %v317_v32 = vadd.f32 %v494_v25, %v316_v30 }
  0xf2   : > { %v357_v33 = vadd.f32 %v494_v25, %v356_v31  ;;  %396 = vst [vmem:[%s831_s27 + $0x8] sm:$0xff] %v322_v28 }
  0xf3   : > { %404 = vst [vmem:[%s831_s27 + $0x48] sm:$0xff] %v362_v29  ;;  %395 = vst [vmem:[%s831_s27] sm:$0xff] %v317_v32  ;;  %v556_v34 = vpop.f32.mrb[2].mxu0 }
  0xf4   : > { %403 = vst [vmem:[%s831_s27 + $0x40] sm:$0xff] %v357_v33  ;;  %v568_v35 = vpop.f32.mrb[2].mxu1  ;;  %v332_v36 = vadd.f32 %v556_v34, %v494_v25  ;;  %v326_v38 = vpop.f32.mrb[3].mxu0 }
  0xf5   : > { %v372_v37 = vadd.f32 %v568_v35, %v494_v25  ;;  %v366_v39 = vpop.f32.mrb[3].mxu1  ;;  %v327_v40 = vadd.f32 %v494_v25, %v326_v38 }
  0xf6   : > { %v367_v41 = vadd.f32 %v494_v25, %v366_v39  ;;  %398 = vst [vmem:[%s831_s27 + $0x18] sm:$0xff] %v332_v36 }
  0xf7   : > { %406 = vst [vmem:[%s831_s27 + $0x58] sm:$0xff] %v372_v37  ;;  %397 = vst [vmem:[%s831_s27 + $0x10] sm:$0xff] %v327_v40  ;;  %v559_v42 = vpop.f32.mrb[4].mxu0 }
  0xf8   : > { %405 = vst [vmem:[%s831_s27 + $0x50] sm:$0xff] %v367_v41  ;;  %v571_v43 = vpop.f32.mrb[4].mxu1  ;;  %v342_v44 = vadd.f32 %v559_v42, %v494_v25  ;;  %v336_v46 = vpop.f32.mrb[5].mxu0 }
  0xf9   : > { %v382_v45 = vadd.f32 %v571_v43, %v494_v25  ;;  %v376_v47 = vpop.f32.mrb[5].mxu1  ;;  %v337_v48 = vadd.f32 %v494_v25, %v336_v46 }
  0xfa   : > { %v377_v49 = vadd.f32 %v494_v25, %v376_v47  ;;  %400 = vst [vmem:[%s831_s27 + $0x28] sm:$0xff] %v342_v44 }
  0xfb   : > { %408 = vst [vmem:[%s831_s27 + $0x68] sm:$0xff] %v382_v45  ;;  %399 = vst [vmem:[%s831_s27 + $0x20] sm:$0xff] %v337_v48  ;;  %v562_v50 = vpop.f32.mrb[6].mxu0 }
  0xfc   : > { %407 = vst [vmem:[%s831_s27 + $0x60] sm:$0xff] %v377_v49  ;;  %v574_v51 = vpop.f32.mrb[6].mxu1  ;;  %v352_v52 = vadd.f32 %v562_v50, %v494_v25  ;;  %v346_v54 = vpop.f32.mrb[7].mxu0 }
  0xfd   : > { %v392_v53 = vadd.f32 %v574_v51, %v494_v25  ;;  %v386_v55 = vpop.f32.mrb[7].mxu1  ;;  %v347_v56 = vadd.f32 %v494_v25, %v346_v54 }
  0xfe   : > { %v387_v57 = vadd.f32 %v494_v25, %v386_v55  ;;  %402 = vst [vmem:[%s831_s27 + $0x38] sm:$0xff] %v352_v52 }
  0xff   : > { %410 = vst [vmem:[%s831_s27 + $0x78] sm:$0xff] %v392_v53  ;;  %401 = vst [vmem:[%s831_s27 + $0x30] sm:$0xff] %v347_v56 }
 0x100   : > { %409 = vst [vmem:[%s831_s27 + $0x70] sm:$0xff] %v387_v57 }
 0x101   : > { %647 = shalt.err (!%p644_p3)
}
 0x102   : > { %s648_s10 = scalar_lea.hbm %s850_s16, 2048  ;;  %s652_s19 = scalar_lea.hbm %s904_s3, 8192 }
 0x103   : > { %p649_p4 = scmp.ne.s32.totalorder %s850_s16, %s648_s10  ;;  %p653_p9 = scmp.lt.u32.totalorder %s850_s16, %s904_s3 }
 0x104   : > { %p654_p10 = scmp.lt.u32.totalorder %s652_s19, %s648_s10  ;;  %p656_p12 = scmp.lt.u32.totalorder %s648_s10, %s850_s16 }
 0x105   : > { %p650_p7 = pnand %p649_p4, %p759_p5 }
 0x106   : > { %p655_p11 = por %p654_p10, %p653_p9 }
 0x107   : > { %p651_p8 = pneg %p650_p7 }
 0x108   : > { %p657_p13 = por %p656_p12, %p655_p11 }
 0x10a   : > { %p658_p0 = pnand %p657_p13, %p651_p8 }
 0x10c   : > { %661 = shalt.err (!%p658_p0)
}
 0x10d   : > { %s699_s25 = smov 128   ;;  %s700_s26 = smov 8  }
 0x10e   : > { %593 = dma.vmem_to_hbm [thread:$0]  (%p759_p5), %s852_s29, 2048, %s850_s16, %s860_s5, %s699_s25, %s699_s25, %s700_s26  }
 0x10f PF: > { %p599_p1 = scmp.ge.s32.totalorder %s696_s15, 2  ;;  %s440_s27 = sand.u32 1, %s684_s12  }
 0x110   : > { %s441_s28 = scalar_lea.sflag [#allocation3], %s440_s27 }
 0x111   : > { %p596_p2 = pnand %p599_p1, %p763_p6 }
 0x113   : > { %679 = dma.done.wait (!%p596_p2), %s441_s28, 2048  }
 0x114   : > { %681 = vsyncadd (!%p596_p2), %s441_s28, 4294965248  ;;  %p13_p3 = scmp.ge.s32.totalorder %s746_s18, 6   ;;  %s907_s12 = smov %s688_s13 }
 0x115   : > { %s908_s13 = smov %s692_s14  ;;  %s909_s14 = smov %s757_s21 }
 0x116   : > { %s910_s15 = smov %s746_s18  ;;  %15 = sbr.rel (!%p13_p3) target bundleno = 3 (0x3), region = 67 }
 0x11d   :  { %446 = vsyncpa [#allocation3], 1 }
 0x11e   :  { %448 = vsyncpa [#allocation3 + $0x1], 1 }

</bundles_post_ra>
